<compile_context>
chip_gen: v7x
topology: tpu7x:2x2x1
jax: 0.10.0
libtpu: 0.0.40
codegen_flags: <defaults>
</compile_context>

<pallas_src>
import functools

import jax
import jax.numpy as jnp
from jax.experimental import pallas as pl
from jax.experimental.pallas import tpu as pltpu

LANE = 128
SUBLANE = 8
TILE_ROWS_MAX = 2048   # (2048,128) f32 block = 1 MiB; 2 inputs x 2 buffers = 4 MiB VMEM
NUM_CORES = 2          # leading "parallel" axis; exact split -> no duplicated work


def _round_up(x, m):
    return ((x + m - 1) // m) * m


def _loss_kernel(scale_ref, pred_ref, tgt_ref, out_ref, acc_ref, *,
                 tile_rows, tiles_core0, tiles_total, rows, has_dummy):
    """Per-core partial of sum((pred - tgt)^2); finalize multiplies by scale (= weight/n)."""
    pc = pl.program_id(0)     # "core" (parallel) index
    kk = pl.program_id(1)     # sequential reduction index within this core

    @pl.when(kk == 0)
    def _init():
        acc_ref[...] = jnp.zeros_like(acc_ref)

    tile_idx = pc * tiles_core0 + kk          # logical tile owned by this step
    last = tiles_total - 1
    ragged = (rows % tile_rows) != 0          # static python bool

    def _accumulate(sq):
        # Sublane-group tree sum into a single (8,128) vreg accumulator: same
        # VALU add count as a full-tile accumulator, but no scratch ld/st
        # traffic in the hot loop and a tiny finalize reduce.
        acc_ref[...] += jnp.sum(
            sq.reshape(tile_rows // SUBLANE, SUBLANE, LANE), axis=0)

    def _full_tile():
        d = pred_ref[...].astype(jnp.float32) - tgt_ref[...].astype(jnp.float32)
        _accumulate(d * d)

    if not ragged and not has_dummy:
        # Steady state: every grid step is a full, real tile -> branch-free hot path.
        _full_tile()
    else:
        full_cond = tile_idx < tiles_total
        if ragged:
            full_cond = jnp.logical_and(full_cond, tile_idx != last)
        pl.when(full_cond)(_full_tile)

        if ragged:
            @pl.when(tile_idx == last)
            def _boundary_tile():
                # Only the single ragged tile pays for iota + masking; operands
                # are masked BEFORE any arithmetic (OOB VMEM rows are unspecified).
                row0 = last * tile_rows
                valid = (row0 + jax.lax.broadcasted_iota(
                    jnp.int32, (tile_rows, LANE), 0)) < rows
                p = jnp.where(valid, pred_ref[...].astype(jnp.float32), 0.0)
                t = jnp.where(valid, tgt_ref[...].astype(jnp.float32), 0.0)
                d = p - t
                _accumulate(d * d)

    @pl.when(kk == pl.num_programs(1) - 1)
    def _finalize():
        # One cross-lane reduce per core + weight/n scaling (scale_ref is SMEM).
        partial = jnp.sum(acc_ref[...]) * scale_ref[0]
        out_ref[...] = jnp.zeros_like(out_ref) + partial   # lane-dense partial store


def _pallas_weighted_mse(pred, target, weight):
    """weight * mean((pred - target)^2), reduction fully inside one Pallas kernel."""
    assert pred.shape == target.shape
    n = pred.size

    # Runtime SMEM scalar: weight fused with 1/n -> no recompile when weight changes.
    scale = jnp.asarray([weight], dtype=jnp.float32) / jnp.float32(n)

    p = pred.reshape(-1)     # contiguous flatten: XLA bitcast, no HBM copy
    t = target.reshape(-1)

    rows = n // LANE
    rem = n % LANE

    tail = jnp.float32(0.0)
    if rem:
        # TODO(synk): when n is not a multiple of 128, the <128-element tail is
        # reduced in plain JAX and the main prefix slice costs one HBM copy;
        # typical tensors (n % 128 == 0) take the copy-free path below.
        dt = p[rows * LANE:].astype(jnp.float32) - t[rows * LANE:].astype(jnp.float32)
        tail = jnp.sum(dt * dt)
        p = p[:rows * LANE]
        t = t[:rows * LANE]

    if rows == 0:
        return scale[0] * tail

    p2 = p.reshape(rows, LANE)   # free reshape (no pad, no copy) when rem == 0
    t2 = t.reshape(rows, LANE)

    tile_rows = min(TILE_ROWS_MAX, _round_up(rows, SUBLANE))
    tiles_total = -(-rows // tile_rows)
    num_cores = min(NUM_CORES, tiles_total)       # never more cores than tiles
    tiles_core0 = -(-tiles_total // num_cores)    # exact split: core 0 ceil, core 1 floor
    has_dummy = num_cores * tiles_core0 > tiles_total

    def in_map(pc, kk):
        if has_dummy:
            # Clamp the single padding step to the previous block index so the
            # pipeline re-uses the buffer (no extra DMA); its compute is skipped.
            return (jnp.minimum(pc * tiles_core0 + kk, tiles_total - 1), 0)
        return (pc * tiles_core0 + kk, 0)

    kernel = functools.partial(
        _loss_kernel, tile_rows=tile_rows, tiles_core0=tiles_core0,
        tiles_total=tiles_total, rows=rows, has_dummy=has_dummy)

    out = pl.pallas_call(
        kernel,
        out_shape=jax.ShapeDtypeStruct((num_cores * SUBLANE, LANE), jnp.float32),
        grid_spec=pltpu.PrefetchScalarGridSpec(
            num_scalar_prefetch=0,
            grid=(num_cores, tiles_core0),
            in_specs=[
                pl.BlockSpec(memory_space=pltpu.MemorySpace.SMEM),   # scale (1,)
                pl.BlockSpec((tile_rows, LANE), in_map),             # pred
                pl.BlockSpec((tile_rows, LANE), in_map),             # target
            ],
            out_specs=pl.BlockSpec((SUBLANE, LANE), lambda pc, kk: (pc, 0)),
            scratch_shapes=[pltpu.VMEM((SUBLANE, LANE), jnp.float32)],
        ),
        compiler_params=pltpu.CompilerParams(
            dimension_semantics=("parallel", "arbitrary"),
        ),
        cost_estimate=pl.CostEstimate(
            flops=3 * rows * LANE,
            transcendentals=0,
            bytes_accessed=rows * LANE * (p2.dtype.itemsize + t2.dtype.itemsize)
            + num_cores * SUBLANE * LANE * 4,
        ),
    )(scale, p2, t2)

    # Per-core partials are lane-dense replicated blocks; one tiny combine,
    # derived from num_cores (works for 1 or 2 cores).
    main = jnp.sum(out[::SUBLANE, 0])
    if rem:
        return main + scale[0] * tail
    return main


class GeneralLoss:
    """JAX/Pallas port of the PyTorch GeneralLoss wrapper."""

    def __init__(self, weight: float = 1.0):
        self.weight = weight
        self.active = weight > 0
        if not self.active:
            print(f"{self.__class__.__name__} deactivated due to weight = {weight}")

    def __call__(self, *inputs):
        if not self.active:
            return (0, {})
        # weight scaling (self.weight * loss) is fused into the kernel finalize
        # via the runtime scale scalar (weight / n).
        output = self.custom_forward(*inputs)
        # NOTE: the PyTorch spec calls .item() here; we keep the on-device
        # scalar to avoid a device->host sync every step (sync at logging time).
        return (output, {self.__class__.__name__: output})

    def custom_forward(self, *inputs):
        # TODO(synk): custom_forward is abstract in the PyTorch base class; a
        # concrete MSE-style reduction is used as the representative child path.
        pred, target = inputs
        return _pallas_weighted_mse(pred, target, self.weight)


if __name__ == "__main__":
    key = jax.random.PRNGKey(0)
    k1, k2 = jax.random.split(key)

    # NCHW inputs, small shapes: batch=2, channels=4, spatial=16x16  (n % 128 == 0 path)
    pred = jax.random.normal(k1, (2, 4, 16, 16), dtype=jnp.float32)
    target = jax.random.normal(k2, (2, 4, 16, 16), dtype=jnp.float32)

    loss_mod = GeneralLoss(weight=0.5)
    out, log_dict = loss_mod(pred, target)
    out = jax.block_until_ready(out)
    ref = 0.5 * jnp.mean((pred - target) ** 2)
    assert jnp.allclose(out, ref, atol=1e-5, rtol=1e-5), (out, ref)

    # ragged path check (rows not a multiple of the tile, sub-lane tail)
    k3, k4 = jax.random.split(k2)
    pred_r = jax.random.normal(k3, (2, 3, 5, 20), dtype=jnp.float32)   # n = 600
    target_r = jax.random.normal(k4, (2, 3, 5, 20), dtype=jnp.float32)
    loss_r = GeneralLoss(weight=1.25)
    out_r, _ = loss_r(pred_r, target_r)
    out_r = jax.block_until_ready(out_r)
    ref_r = 1.25 * jnp.mean((pred_r - target_r) ** 2)
    assert jnp.allclose(out_r, ref_r, atol=1e-5, rtol=1e-5), (out_r, ref_r)

    # deactivated-path check (weight <= 0 returns (0, {}))
    inactive = GeneralLoss(weight=0.0)
    assert inactive(pred, target) == (0, {})

    print("KERNEL_OK")
</pallas_src>

<mosaic_0001>
module attributes {stable_mosaic.version = 11 : i64} {
  func.func @_loss_kernel(%arg0: i32, %arg1: i32, %arg2: memref<1xf32, #tpu.memory_space<smem>>, %arg3: memref<16x128xf32, #tpu.memory_space<vmem>>, %arg4: memref<16x128xf32, #tpu.memory_space<vmem>>, %arg5: memref<8x128xf32, #tpu.memory_space<vmem>>, %arg6: memref<8x128xf32, #tpu.memory_space<vmem>>) attributes {dimension_semantics = [#tpu.dimension_semantics<parallel>, #tpu.dimension_semantics<arbitrary>], iteration_bounds = array<i64: 1, 1>, scalar_prefetch = 0 : i64, scratch_operands = 1 : i64, tpu.core_type = #tpu.core_type<tc>, window_params = [{transform_indices = @transform_0, window_bounds = array<i64: 1>}, {transform_indices = @transform_1, window_bounds = array<i64: 16, 128>}, {transform_indices = @transform_2, window_bounds = array<i64: 16, 128>}, {transform_indices = @transform_3, window_bounds = array<i64: 8, 128>}]} {
    %c0_i32 = arith.constant 0 : i32
    %0 = arith.cmpi eq, %arg1, %c0_i32 : i32
    %1 = arith.extui %0 : i1 to i32
    %c0_i32_0 = arith.constant 0 : i32
    %2 = arith.cmpi ne, %1, %c0_i32_0 : i32
    scf.if %2 {
      %cst_10 = arith.constant 0.000000e+00 : f32
      %15 = vector.broadcast %cst_10 : f32 to vector<8x128xf32>
      %c0_11 = arith.constant 0 : index
      %c0_12 = arith.constant 0 : index
      %16 = vector.load %arg6[%c0_11, %c0_12] : memref<8x128xf32, #tpu.memory_space<vmem>>, vector<8x128xf32>
      tpu.vector_store %arg6[%c0_11, %c0_12], %15 {strides = array<i32>} : memref<8x128xf32, #tpu.memory_space<vmem>>, vector<8x128xf32>,
    } else {
    }
    %c0 = arith.constant 0 : index
    %c0_1 = arith.constant 0 : index
    %3 = vector.load %arg3[%c0, %c0_1] : memref<16x128xf32, #tpu.memory_space<vmem>>, vector<16x128xf32>
    %c0_2 = arith.constant 0 : index
    %c0_3 = arith.constant 0 : index
    %4 = vector.load %arg4[%c0_2, %c0_3] : memref<16x128xf32, #tpu.memory_space<vmem>>, vector<16x128xf32>
    %5 = arith.subf %3, %4 : vector<16x128xf32>
    %6 = arith.mulf %5, %5 : vector<16x128xf32>
    %c0_4 = arith.constant 0 : index
    %c0_5 = arith.constant 0 : index
    %7 = vector.load %arg6[%c0_4, %c0_5] : memref<8x128xf32, #tpu.memory_space<vmem>>, vector<8x128xf32>
    %8 = vector.shape_cast %6 : vector<16x128xf32> to vector<2x8x128xf32>
    %cst = arith.constant dense<0.000000e+00> : vector<8x128xf32>
    %9 = vector.multi_reduction <add>, %8, %cst [0] : vector<2x8x128xf32> to vector<8x128xf32>
    %10 = arith.addf %7, %9 : vector<8x128xf32>
    %c0_6 = arith.constant 0 : index
    %c0_7 = arith.constant 0 : index
    %11 = vector.load %arg6[%c0_6, %c0_7] : memref<8x128xf32, #tpu.memory_space<vmem>>, vector<8x128xf32>
    tpu.vector_store %arg6[%c0_6, %c0_7], %10 {strides = array<i32>} : memref<8x128xf32, #tpu.memory_space<vmem>>, vector<8x128xf32>,
    %c0_i32_8 = arith.constant 0 : i32
    %12 = arith.cmpi eq, %arg1, %c0_i32_8 : i32
    %13 = arith.extui %12 : i1 to i32
    %c0_i32_9 = arith.constant 0 : i32
    %14 = arith.cmpi ne, %13, %c0_i32_9 : i32
    scf.if %14 {
      %c0_10 = arith.constant 0 : index
      %c0_11 = arith.constant 0 : index
      %15 = vector.load %arg6[%c0_10, %c0_11] : memref<8x128xf32, #tpu.memory_space<vmem>>, vector<8x128xf32>
      %16 = vector.shape_cast %15 : vector<8x128xf32> to vector<1x8x128xf32>
      %cst_12 = arith.constant dense<0.000000e+00> : vector<1xf32>
      %17 = vector.multi_reduction <add>, %16, %cst_12 [1, 2] : vector<1x8x128xf32> to vector<1xf32>
      %18 = vector.shape_cast %17 : vector<1xf32> to vector<1x1x1xf32>
      %19 = vector.extract %18[0, 0, 0] : f32 from vector<1x1x1xf32>
      %c0_13 = arith.constant 0 : index
      %20 = memref.load %arg2[%c0_13] : memref<1xf32, #tpu.memory_space<smem>>
      %21 = arith.mulf %19, %20 : f32
      %cst_14 = arith.constant 0.000000e+00 : f32
      %22 = vector.broadcast %cst_14 : f32 to vector<8x128xf32>
      %23 = vector.broadcast %21 : f32 to vector<8x128xf32>
      %24 = arith.addf %22, %23 : vector<8x128xf32>
      %c0_15 = arith.constant 0 : index
      %c0_16 = arith.constant 0 : index
      %25 = vector.load %arg5[%c0_15, %c0_16] : memref<8x128xf32, #tpu.memory_space<vmem>>, vector<8x128xf32>
      tpu.vector_store %arg5[%c0_15, %c0_16], %24 {strides = array<i32>} : memref<8x128xf32, #tpu.memory_space<vmem>>, vector<8x128xf32>,
    } else {
    }
    return
  }
  func.func @transform_0(%arg0: i32, %arg1: i32) -> i32 {
    %c0_i32 = arith.constant 0 : i32
    %c0_i32_0 = arith.constant 0 : i32
    return %c0_i32 : i32
  }
  func.func @transform_1(%arg0: i32, %arg1: i32) -> (i32, i32) {
    %c1_i32 = arith.constant 1 : i32
    %0 = arith.muli %arg0, %c1_i32 : i32
    %1 = arith.addi %0, %arg1 : i32
    %c0_i32 = arith.constant 0 : i32
    %c0_i32_0 = arith.constant 0 : i32
    return %1, %c0_i32 : i32, i32
  }
  func.func @transform_2(%arg0: i32, %arg1: i32) -> (i32, i32) {
    %c1_i32 = arith.constant 1 : i32
    %0 = arith.muli %arg0, %c1_i32 : i32
    %1 = arith.addi %0, %arg1 : i32
    %c0_i32 = arith.constant 0 : i32
    %c0_i32_0 = arith.constant 0 : i32
    return %1, %c0_i32 : i32, i32
  }
  func.func @transform_3(%arg0: i32, %arg1: i32) -> (i32, i32) {
    %c0_i32 = arith.constant 0 : i32
    %c0_i32_0 = arith.constant 0 : i32
    return %arg0, %c0_i32 : i32, i32
  }
}

</mosaic_0001>

<bundles_post_ra>
// kernel: tpu_custom_call.1
= control target key start
LH: loop header
LB: loop body
LE: loop exit
PB: predicated region body
PF: predicated region fallthrough
CT: control target
= control target key end

     0   :  { %9 = vsyncpa [#allocation5], 0  ;;  %s250_s0 = inlined_call_operand.<no memory space> [shape: f32[1], index: 0, kind: input, shape index: {}]   ;;  %s251_s1 = inlined_call_operand.hbm [shape: f32[16,128], index: 1, kind: input, shape index: {}]   ;;  %s252_s2 = inlined_call_operand.hbm [shape: f32[16,128], index: 2, kind: input, shape index: {}]   ;;  %s253_s3 = inlined_call_operand.hbm [shape: f32[8,128], index: 3, kind: output, shape index: {}]  }
   0x1   :  { %10 = vsyncpa [#allocation8], 0 }
   0x2   :  { %11 = vsyncpa [#allocation6], 0  ;;  %s186_s12 = smov [#allocation4]   ;;  %s114_s16 = scalar_lea.hbm %s251_s1, 256 }
   0x3   :  { %s23_s13 = sshll.u32 %s186_s12, 4  ;;  %p115_p0 = scmp.ne.s32.totalorder %s251_s1, %s114_s16  ;;  %s24_s13 = int_to_ptr.vmem [resolvable:$true] %s23_s13 }
   0x4   :  { %p118_p1 = scmp.lt.u32.totalorder %s114_s16, %s251_s1 }
   0x6   :  { %p120_p2 = pnand %p118_p1, %p115_p0 }
   0x8   :  { %123 = shalt.err (!%p120_p2)
}
   0x9   :  { %s124_s21 = scalar_lea.vmem %s24_s13, 256  ;;  %p129_p4 = scmp.lt.s32.totalorder %s24_s13, %s24_s13 }
   0xa   :  { %p125_p3 = scmp.ne.s32.totalorder %s24_s13, %s124_s21  ;;  %p130_p5 = scmp.lt.s32.totalorder %s124_s21, %s124_s21 }
   0xc   :  { %p131_p6 = por %p130_p5, %p129_p4 }
   0xe   :  { %p132_p7 = pnand %p131_p6, %p125_p3 }
  0x10   :  { %135 = shalt.err (!%p132_p7)
}
  0x11   :  { %s187_s22 = smov 128   ;;  %s188_s23 = smov 8  }
  0x12   :  { %29 = dma.hbm_to_vmem [thread:$0]  %s251_s1, 256, %s24_s13, [#allocation5], %s187_s22, %s187_s22, %s188_s23  }
  0x13   :  { %s189_s26 = smov [#allocation7]   ;;  %s136_s30 = scalar_lea.hbm %s252_s2, 256 }
  0x14   :  { %s39_s27 = sshll.u32 %s189_s26, 4  ;;  %p137_p8 = scmp.ne.s32.totalorder %s252_s2, %s136_s30  ;;  %s40_s27 = int_to_ptr.vmem [resolvable:$true] %s39_s27 }
  0x15   :  { %p140_p9 = scmp.lt.u32.totalorder %s136_s30, %s252_s2 }
  0x17   :  { %p142_p10 = pnand %p140_p9, %p137_p8 }
  0x19   :  { %145 = shalt.err (!%p142_p10)
}
  0x1a   :  { %s146_s8 = scalar_lea.vmem %s40_s27, 256  ;;  %p151_p12 = scmp.lt.s32.totalorder %s40_s27, %s40_s27 }
  0x1b   :  { %p147_p11 = scmp.ne.s32.totalorder %s40_s27, %s146_s8  ;;  %p152_p13 = scmp.lt.s32.totalorder %s146_s8, %s146_s8 }
  0x1d   :  { %p153_p0 = por %p152_p13, %p151_p12 }
  0x1f   :  { %p154_p1 = pnand %p153_p0, %p147_p11 }
  0x21   :  { %157 = shalt.err (!%p154_p1)
}
  0x22   :  { %45 = dma.hbm_to_vmem [thread:$0]  %s252_s2, 256, %s40_s27, [#allocation8], %s187_s22, %s187_s22, %s188_s23  }
  0x23   :  { %180 = dma.done.wait [#allocation5], 256  }
  0x24   :  { %181 = vsyncadd [#allocation5], 4294967040 }
  0x25   :  { %182 = dma.done.wait [#allocation8], 256  }
  0x26   :  { %183 = vsyncadd [#allocation8], 4294967040  ;;  %v61_v0 = vld [vmem:[#allocation4] sm:$0xff]  ;;  %v62_v1 = vld [vmem:[#allocation4 + $0x8] sm:$0xff]  ;;  %s190_s2 = smov [#allocation9]  }
  0x27   :  { %v63_v2 = vld [vmem:[#allocation7] sm:$0xff]  ;;  %v64_v3 = vld [vmem:[#allocation7 + $0x8] sm:$0xff]  ;;  %s97_s10 = sshll.u32 %s190_s2, 4  ;;  %s98_s10 = int_to_ptr.vmem [resolvable:$true] %s97_s10 }
  0x28   :  { %v65_v4 = vsub.f32 %v61_v0, %v63_v2  ;;  %v66_v5 = vsub.f32 %v62_v1, %v64_v3  ;;  %s158_s15 = scalar_lea.vmem %s98_s10, 128  ;;  %p163_p3 = scmp.lt.s32.totalorder %s98_s10, %s98_s10 }
  0x29   :  { %p159_p2 = scmp.ne.s32.totalorder %s98_s10, %s158_s15  ;;  %p164_p4 = scmp.lt.s32.totalorder %s158_s15, %s158_s15 }
  0x2a   :  { %v67_v6 = vmul.f32 %v65_v4, %v65_v4  ;;  %v68_v7 = vmul.f32 %v66_v5, %v66_v5 }
  0x2b   :  { %p165_p5 = por %p164_p4, %p163_p3 }
  0x2c   :  { %v70_v8 = vadd.f32 %v68_v7, %v67_v6 }
  0x2d   :  { %p166_p6 = pnand %p165_p5, %p159_p2 }
  0x2e   :  { %77 = vadd.xlane.f32.xlu0 %v70_v8 }
  0xbb   :  { %v78_v9 = vpop.xlane.xlu0 %77 }
  0xbc   :  { %v79_v10 = vrot.slane %v78_v9, 4 }
  0xbe   :  { %v80_v11 = vadd.f32 %v79_v10, %v78_v9 }
  0xc0   :  { %v81_v12 = vrot.slane %v80_v11, 2 }
  0xc2   :  { %v82_v13 = vadd.f32 %v81_v12, %v80_v11 }
  0xc4   :  { %v83_v14 = vrot.slane %v82_v13, 1 }
  0xc6   :  { %v84_v15 = vadd.f32 %v83_v14, %v82_v13 }
  0xc8   :  { %107 = vpush %v84_v15 }
  0xf9   :  { %s108_s11 = spop %107 }
  0xfa   :  { %s87_s14 = smul.f32 %s108_s11, %s250_s0 }
  0xfc   :  { %v88_v16 = vstv %s87_s14 }
  0xfd   :  { %90 = vst [vmem:[#allocation9] sm:$0xff] %v88_v16 }
  0xfe   :  { %169 = shalt.err (!%p166_p6)
}
  0xff   :  { %s170_s18 = scalar_lea.hbm %s253_s3, 128 }
 0x100   :  { %p171_p7 = scmp.ne.s32.totalorder %s253_s3, %s170_s18  ;;  %p174_p8 = scmp.lt.u32.totalorder %s170_s18, %s253_s3 }
 0x102   :  { %p176_p9 = pnand %p174_p8, %p171_p7 }
 0x104   :  { %179 = shalt.err (!%p176_p9)
}
 0x105   :  { %100 = dma.vmem_to_hbm [thread:$0]  %s98_s10, 128, %s253_s3, [#allocation6]  }
 0x106   :  { %184 = dma.done.wait [#allocation6], 128  }
 0x107   :  { %185 = vsyncadd [#allocation6], 4294967168 }
 0x108   :  { %104 = vsyncpa [#allocation5], 1 }
 0x109   :  { %105 = vsyncpa [#allocation8], 1 }
 0x10a   :  { %106 = vsyncpa [#allocation6], 1 }

</bundles_post_ra>
